<compile_context>
chip_gen: v6e
topology: v6e:2x2x1
jax: 0.10.0
libtpu: 0.0.40
codegen_flags: <defaults>
</compile_context>

<pallas_src>
import functools

import jax
import jax.numpy as jnp
from jax.experimental import pallas as pl
from jax.experimental.pallas import tpu as pltpu

_SUB = 8      # sublane granularity for the second-to-last block dim
_LANE = 128   # lane granularity for the last block dim


def _round_up(v, m):
    return ((v + m - 1) // m) * m


def _pipeline_mode_supported():
    try:
        pl.BlockSpec((_SUB, _LANE), lambda i: (i, 0), pipeline_mode=pl.Buffered(1))
        return True
    except Exception:  # older jax without BlockSpec.pipeline_mode / pl.Buffered
        return False


_HAS_PIPELINE_MODE = _pipeline_mode_supported()


def _spec(shape, index_map, buffer_count):
    """BlockSpec with an explicit pipeline depth (graceful fallback to default)."""
    if _HAS_PIPELINE_MODE:
        return pl.BlockSpec(shape, index_map, pipeline_mode=pl.Buffered(buffer_count))
    return pl.BlockSpec(shape, index_map)


# --------------------------------------------------------------------------- #
# Kernel
# --------------------------------------------------------------------------- #
def _mlp_kernel(x_ref, w1_ref, b1_ref, w2_ref, b2_ref, o_ref, *, approx_reciprocal):
    # fc1 on the MXU with f32 accumulation. The x tile is cast in-kernel (VMEM)
    # so the bf16 path never needs a separate wrapper-side HBM cast pass.
    x = x_ref[...].astype(w1_ref.dtype)
    h = jnp.dot(x, w1_ref[...], preferred_element_type=jnp.float32)
    h = jnp.maximum(h + b1_ref[...], 0.0)          # bias + ReLU in f32 (VPU)

    # fc2: padded hidden rows of w2 are zero; padded class columns have zero
    # weights and a -1e30 bias so they vanish under the softmax below.
    logits = jnp.dot(h.astype(w2_ref.dtype), w2_ref[...],
                     preferred_element_type=jnp.float32)
    logits = logits + b2_ref[...]                  # bias add stays f32

    # softmax over the (padded, lane-dense) class axis.
    m = jnp.max(logits, axis=-1, keepdims=True)
    e = jnp.exp(logits - m)
    denom = jnp.sum(e, axis=-1, keepdims=True)
    if approx_reciprocal:
        inv = pl.reciprocal(denom, approx=True)    # EUP slot; rows sum to 1 +- ~1e-3
    else:
        inv = 1.0 / denom                          # exact: rows sum to 1 (f32 rounding)
    o_ref[...] = (e * inv).astype(o_ref.dtype)


# --------------------------------------------------------------------------- #
# One-time parameter packing (keep OUT of the per-call jitted forward)
# --------------------------------------------------------------------------- #
def prepare_mlp_params(w1, b1, w2, b2, *, matmul_dtype=jnp.float32, hidden_align=_LANE):
    """
    Pack PyTorch-style MLP parameters once.

    w1: (input_dim, hidden_dim)   == fc1.weight.T
    b1: (hidden_dim,) or (1, hidden_dim)
    w2: (hidden_dim, output_dim)  == fc2.weight.T
    b2: (output_dim,) or (1, output_dim)
    matmul_dtype: jnp.float32 or jnp.bfloat16 (weights only; biases stay f32).
    hidden_align: pad the hidden axis to this multiple (128 = lane width;
                  256 matches the v6e/v7x MXU tile for large hidden dims).

    Returns (w1_p, b1_p, w2_p, b2_p, d_out).
    """
    w1 = jnp.asarray(w1, jnp.float32)
    w2 = jnp.asarray(w2, jnp.float32)
    d_in, h = w1.shape
    h2, d_out = w2.shape
    assert h == h2, "fc1 output dim must match fc2 input dim"
    b1 = jnp.asarray(b1, jnp.float32).reshape(1, h)
    b2 = jnp.asarray(b2, jnp.float32).reshape(1, d_out)

    h_pad = _round_up(h, max(_LANE, int(hidden_align)))
    d_pad = _round_up(d_out, _LANE)

    # Zero-padded hidden units: relu(0 + 0) == 0, contribute nothing to fc2.
    w1_p = jnp.zeros((d_in, h_pad), jnp.float32).at[:, :h].set(w1)
    b1_p = jnp.zeros((1, h_pad), jnp.float32).at[:, :h].set(b1)
    # Padded class columns: zero weights + -1e30 bias -> exp(logit - max) == 0.
    w2_p = jnp.zeros((h_pad, d_pad), jnp.float32).at[:h, :d_out].set(w2)
    b2_p = jnp.full((1, d_pad), -1e30, jnp.float32).at[:, :d_out].set(b2)

    # Only the matmul operands are cast; biases (and the -1e30 sentinel) stay f32.
    return (w1_p.astype(matmul_dtype), b1_p, w2_p.astype(matmul_dtype), b2_p, int(d_out))


# --------------------------------------------------------------------------- #
# Batch-tile / VMEM planning (sized for v7x's 64 MiB physical VMEM)
# --------------------------------------------------------------------------- #
def _plan_tiling(B, d_in, h_pad, d_pad, x_itemsize, w_itemsize, tb_request):
    w_bufs = 1 if _HAS_PIPELINE_MODE else 2        # resident weights single-buffered
    weight_bytes = w_bufs * ((d_in * h_pad + h_pad * d_pad) * w_itemsize
                             + (h_pad + d_pad) * 4)

    # Memory-bound regime (tiny per-tile MXU work) -> deepen the x stream.
    x_bufs = 3 if (d_in * h_pad + h_pad * d_pad) * w_itemsize < (1 << 21) else 2

    per_row = (x_bufs * d_in * x_itemsize          # x stream buffers
               + 2 * d_pad * 4                     # double-buffered f32 output stream
               + (h_pad + d_pad) * 4)              # f32 fc1 intermediate + logits
    budget = 48 * 1024 * 1024                      # conservative vs v7x 64 MiB physical
    avail = max(budget - weight_bytes, 1 << 20)
    tb_cap = max(_SUB, (avail // per_row) // _SUB * _SUB)
    tb_req = _round_up(max(int(tb_request), _SUB), _SUB)   # sublane-aligned user tb
    tb_cap = min(tb_cap, tb_req)

    nb = -(-B // tb_cap)
    if nb == 1 and B > _SUB:
        nb = 2                                     # give v7x's second TensorCore work
    TB = min(tb_cap, _round_up(-(-B // nb), _SUB)) # padding waste < 8 rows per tile
    nb = -(-B // TB)
    x_bufs = max(1, min(x_bufs, nb))

    footprint = (weight_bytes
                 + x_bufs * TB * d_in * x_itemsize
                 + 2 * TB * d_pad * 4
                 + 2 * TB * (h_pad + d_pad) * 4)   # in-kernel f32 temporaries
    vmem_limit = int(min(max(int(footprint * 1.25), 32 * 1024 * 1024),
                         64 * 1024 * 1024))
    return TB, nb, x_bufs, vmem_limit


# --------------------------------------------------------------------------- #
# Forward (jit this; parameters come pre-packed from prepare_mlp_params)
# --------------------------------------------------------------------------- #
def mlp_classifier_forward(x, w1, b1, w2, b2, *, d_out, tb=512, approx_reciprocal=False):
    """
    x : (B, input_dim) f32 (or bf16 straight from the producer)
    w1, b1, w2, b2: packed/padded parameters from prepare_mlp_params()
    returns: (B, d_out) f32 softmax probabilities (rows sum to 1).
    """
    x = jnp.asarray(x)
    if x.dtype not in (jnp.float32, jnp.bfloat16):
        x = x.astype(jnp.float32)
    B, d_in = x.shape
    h_pad = w1.shape[1]
    d_pad = w2.shape[1]

    TB, nb, x_bufs, vmem_limit = _plan_tiling(
        B, d_in, h_pad, d_pad, x.dtype.itemsize, w1.dtype.itemsize, tb)
    B_pad = nb * TB
    x_p = x if B_pad == B else jnp.pad(x, ((0, B_pad - B), (0, 0)))

    flops = 2 * B_pad * (d_in * h_pad + h_pad * d_pad)
    transcendentals = B_pad * d_pad                          # exp per (padded) logit
    bytes_accessed = (x.dtype.itemsize * B_pad * d_in
                      + w1.dtype.itemsize * (d_in * h_pad + h_pad * d_pad)
                      + 4 * (B_pad * d_pad + h_pad + d_pad))

    out = pl.pallas_call(
        functools.partial(_mlp_kernel, approx_reciprocal=approx_reciprocal),
        out_shape=jax.ShapeDtypeStruct((B_pad, d_pad), jnp.float32),
        grid=(nb,),
        in_specs=[
            _spec((TB, d_in), lambda i: (i, 0), x_bufs),     # x: streamed per tile
            _spec((d_in, h_pad), lambda i: (0, 0), 1),       # w1: resident, 1 buffer
            _spec((1, h_pad), lambda i: (0, 0), 1),          # b1: resident
            _spec((h_pad, d_pad), lambda i: (0, 0), 1),      # w2 (padded): resident
            _spec((1, d_pad), lambda i: (0, 0), 1),          # b2 (padded): resident
        ],
        out_specs=pl.BlockSpec((TB, d_pad), lambda i: (i, 0)),
        compiler_params=pltpu.CompilerParams(
            dimension_semantics=("parallel",),               # megacore sharding on v7x
            vmem_limit_bytes=vmem_limit,
        ),
        cost_estimate=pl.CostEstimate(
            flops=int(flops),
            transcendentals=int(transcendentals),
            bytes_accessed=int(bytes_accessed),
        ),
    )(x_p, w1, b1, w2, b2)

    # Strip batch padding and the lane-padded (dead) class columns.
    return out[:B, :d_out]


def _reference(x, w1, b1, w2, b2):
    h = jnp.maximum(x @ w1 + b1.reshape(1, -1), 0.0)
    logits = h @ w2 + b2.reshape(1, -1)
    return jax.nn.softmax(logits, axis=1)


if __name__ == "__main__":
    # Small shapes consistent with the module: batch=8, input_dim=32, hidden=32, output_dim=2.
    B, D_in, H, D_out = 8, 32, 32, 2

    key = jax.random.PRNGKey(0)
    kx, kw1, kb1, kw2, kb2 = jax.random.split(key, 5)
    x = jax.random.normal(kx, (B, D_in), dtype=jnp.float32)
    bound1 = 1.0 / (D_in ** 0.5)
    bound2 = 1.0 / (H ** 0.5)
    w1 = jax.random.uniform(kw1, (D_in, H), minval=-bound1, maxval=bound1, dtype=jnp.float32)
    b1 = jax.random.uniform(kb1, (H,), minval=-bound1, maxval=bound1, dtype=jnp.float32)
    w2 = jax.random.uniform(kw2, (H, D_out), minval=-bound2, maxval=bound2, dtype=jnp.float32)
    b2 = jax.random.uniform(kb2, (D_out,), minval=-bound2, maxval=bound2, dtype=jnp.float32)

    ref = _reference(x, w1, b1, w2, b2)

    # ---- f32 path (default): exact softmax normalization -------------------
    params_f32 = prepare_mlp_params(w1, b1, w2, b2)          # one-time packing
    w1_f, b1_f, w2_f, b2_f, d_out = params_f32
    fwd = jax.jit(functools.partial(mlp_classifier_forward, d_out=d_out, tb=512))
    out = jax.block_until_ready(fwd(x, w1_f, b1_f, w2_f, b2_f))
    assert out.shape == (B, D_out)
    # Tolerance accounts for the TPU default-precision f32 matmul in the XLA reference.
    assert jnp.allclose(out, ref, atol=2e-3, rtol=2e-3), "f32 mismatch vs reference"
    assert jnp.allclose(jnp.sum(out, axis=1), 1.0, atol=1e-5), "softmax rows must sum to 1"

    # ---- bf16 matmul path (v6e/v7x VMEM/HBM win); accumulation stays f32 ---
    w1_b, b1_b, w2_b, b2_b, d_out_b = prepare_mlp_params(w1, b1, w2, b2,
                                                         matmul_dtype=jnp.bfloat16)
    fwd_bf16 = jax.jit(functools.partial(mlp_classifier_forward, d_out=d_out_b, tb=512))
    out_b = jax.block_until_ready(fwd_bf16(x, w1_b, b1_b, w2_b, b2_b))
    assert jnp.allclose(out_b, ref, atol=2e-2, rtol=2e-2), "bf16 mismatch vs reference"
    assert jnp.allclose(jnp.sum(out_b, axis=1), 1.0, atol=1e-4), "bf16 rows must sum to 1"

    print("KERNEL_OK")
</pallas_src>

<mosaic_0001>
module attributes {stable_mosaic.version = 11 : i64} {
  func.func @_mlp_kernel(%arg0: i32, %arg1: memref<8x32xf32, #tpu.memory_space<vmem>>, %arg2: memref<32x128xf32, #tpu.memory_space<vmem>>, %arg3: memref<1x128xf32, #tpu.memory_space<vmem>>, %arg4: memref<128x128xf32, #tpu.memory_space<vmem>>, %arg5: memref<1x128xf32, #tpu.memory_space<vmem>>, %arg6: memref<8x128xf32, #tpu.memory_space<vmem>>) attributes {dimension_semantics = [#tpu.dimension_semantics<parallel>], iteration_bounds = array<i64: 1>, scalar_prefetch = 0 : i64, scratch_operands = 0 : i64, tpu.core_type = #tpu.core_type<tc>, window_params = [{pipeline_mode = #tpu.pipeline_mode<synchronous>, transform_indices = @transform_0, window_bounds = array<i64: 8, 32>}, {pipeline_mode = #tpu.pipeline_mode<synchronous>, transform_indices = @transform_1, window_bounds = array<i64: 32, 128>}, {pipeline_mode = #tpu.pipeline_mode<synchronous>, transform_indices = @transform_2, window_bounds = array<i64: 1, 128>}, {pipeline_mode = #tpu.pipeline_mode<synchronous>, transform_indices = @transform_3, window_bounds = array<i64: 128, 128>}, {pipeline_mode = #tpu.pipeline_mode<synchronous>, transform_indices = @transform_4, window_bounds = array<i64: 1, 128>}, {transform_indices = @transform_5, window_bounds = array<i64: 8, 128>}]} {
    %c0 = arith.constant 0 : index
    %c0_0 = arith.constant 0 : index
    %0 = vector.load %arg1[%c0, %c0_0] : memref<8x32xf32, #tpu.memory_space<vmem>>, vector<8x32xf32>
    %c0_1 = arith.constant 0 : index
    %c0_2 = arith.constant 0 : index
    %1 = vector.load %arg2[%c0_1, %c0_2] : memref<32x128xf32, #tpu.memory_space<vmem>>, vector<32x128xf32>
    %cst = arith.constant dense<0.000000e+00> : vector<8x128xf32>
    %2 = tpu.matmul %0, %1, %cst {dimension_numbers = #tpu.dot_dimension_numbers<[1], [0], [0], [1], [0, 0, 1, 1], [], []>} : vector<8x32xf32>, vector<32x128xf32>, vector<8x128xf32> -> vector<8x128xf32>
    %c0_3 = arith.constant 0 : index
    %c0_4 = arith.constant 0 : index
    %3 = vector.load %arg3[%c0_3, %c0_4] : memref<1x128xf32, #tpu.memory_space<vmem>>, vector<1x128xf32>
    %4 = vector.broadcast %3 : vector<1x128xf32> to vector<8x128xf32>
    %5 = arith.addf %2, %4 : vector<8x128xf32>
    %cst_5 = arith.constant 0.000000e+00 : f32
    %6 = vector.broadcast %cst_5 : f32 to vector<8x128xf32>
    %7 = arith.maximumf %5, %6 : vector<8x128xf32>
    %c0_6 = arith.constant 0 : index
    %c0_7 = arith.constant 0 : index
    %8 = vector.load %arg4[%c0_6, %c0_7] : memref<128x128xf32, #tpu.memory_space<vmem>>, vector<128x128xf32>
    %cst_8 = arith.constant dense<0.000000e+00> : vector<8x128xf32>
    %9 = tpu.matmul %7, %8, %cst_8 {dimension_numbers = #tpu.dot_dimension_numbers<[1], [0], [0], [1], [0, 0, 1, 1], [], []>} : vector<8x128xf32>, vector<128x128xf32>, vector<8x128xf32> -> vector<8x128xf32>
    %c0_9 = arith.constant 0 : index
    %c0_10 = arith.constant 0 : index
    %10 = vector.load %arg5[%c0_9, %c0_10] : memref<1x128xf32, #tpu.memory_space<vmem>>, vector<1x128xf32>
    %11 = vector.broadcast %10 : vector<1x128xf32> to vector<8x128xf32>
    %12 = arith.addf %9, %11 : vector<8x128xf32>
    %cst_11 = arith.constant dense<0xFF800000> : vector<8xf32>
    %13 = vector.multi_reduction <maximumf>, %12, %cst_11 [1] : vector<8x128xf32> to vector<8xf32>
    %14 = vector.shape_cast %13 : vector<8xf32> to vector<8x1xf32>
    %15 = vector.broadcast %14 : vector<8x1xf32> to vector<8x128xf32>
    %16 = arith.subf %12, %15 : vector<8x128xf32>
    %17 = math.exp %16 : vector<8x128xf32>
    %cst_12 = arith.constant dense<0.000000e+00> : vector<8xf32>
    %18 = vector.multi_reduction <add>, %17, %cst_12 [1] : vector<8x128xf32> to vector<8xf32>
    %19 = vector.shape_cast %18 : vector<8xf32> to vector<8x1xf32>
    %cst_13 = arith.constant 1.000000e+00 : f32
    %20 = vector.broadcast %cst_13 : f32 to vector<8x1xf32>
    %21 = arith.divf %20, %19 : vector<8x1xf32>
    %22 = vector.broadcast %21 : vector<8x1xf32> to vector<8x128xf32>
    %23 = arith.mulf %17, %22 : vector<8x128xf32>
    %c0_14 = arith.constant 0 : index
    %c0_15 = arith.constant 0 : index
    %24 = vector.load %arg6[%c0_14, %c0_15] : memref<8x128xf32, #tpu.memory_space<vmem>>, vector<8x128xf32>
    tpu.vector_store %arg6[%c0_14, %c0_15], %23 {strides = array<i32>} : memref<8x128xf32, #tpu.memory_space<vmem>>, vector<8x128xf32>,
    return
  }
  func.func @transform_0(%arg0: i32) -> (i32, i32) {
    %c0_i32 = arith.constant 0 : i32
    %c0_i32_0 = arith.constant 0 : i32
    return %arg0, %c0_i32 : i32, i32
  }
  func.func @transform_1(%arg0: i32) -> (i32, i32) {
    %c0_i32 = arith.constant 0 : i32
    %c0_i32_0 = arith.constant 0 : i32
    %c0_i32_1 = arith.constant 0 : i32
    return %c0_i32, %c0_i32_0 : i32, i32
  }
  func.func @transform_2(%arg0: i32) -> (i32, i32) {
    %c0_i32 = arith.constant 0 : i32
    %c0_i32_0 = arith.constant 0 : i32
    %c0_i32_1 = arith.constant 0 : i32
    return %c0_i32, %c0_i32_0 : i32, i32
  }
  func.func @transform_3(%arg0: i32) -> (i32, i32) {
    %c0_i32 = arith.constant 0 : i32
    %c0_i32_0 = arith.constant 0 : i32
    %c0_i32_1 = arith.constant 0 : i32
    return %c0_i32, %c0_i32_0 : i32, i32
  }
  func.func @transform_4(%arg0: i32) -> (i32, i32) {
    %c0_i32 = arith.constant 0 : i32
    %c0_i32_0 = arith.constant 0 : i32
    %c0_i32_1 = arith.constant 0 : i32
    return %c0_i32, %c0_i32_0 : i32, i32
  }
  func.func @transform_5(%arg0: i32) -> (i32, i32) {
    %c0_i32 = arith.constant 0 : i32
    %c0_i32_0 = arith.constant 0 : i32
    return %arg0, %c0_i32 : i32, i32
  }
}

</mosaic_0001>

<bundles_post_ra>
// kernel: mlp_classifier_forward.1
= control target key start
LH: loop header
LB: loop body
LE: loop exit
PB: predicated region body
PF: predicated region fallthrough
CT: control target
= control target key end

     0   :  { %10 = vsyncpa [#allocation3], 0  ;;  %s479_s0 = inlined_call_operand.hbm [shape: f32[8,32], index: 0, kind: input, shape index: {}]   ;;  %s480_s1 = inlined_call_operand.hbm [shape: f32[32,128], index: 1, kind: input, shape index: {}]   ;;  %s481_s2 = inlined_call_operand.vmem [shape: f32[1,128], index: 2, kind: input, shape index: {}]   ;;  %s482_s3 = inlined_call_operand.hbm [shape: f32[128,128], index: 3, kind: input, shape index: {}]   ;;  %s483_s4 = inlined_call_operand.vmem [shape: f32[1,128], index: 4, kind: input, shape index: {}]   ;;  %s484_s5 = inlined_call_operand.vmem [shape: f32[8,128], index: 5, kind: output, shape index: {}]  }
   0x1   :  { %11 = vsyncpa [#allocation5], 0  ;;  %s402_s18 = smov [#allocation4]  }
   0x2   :  { %s27_s19 = sshll.u32 %s402_s18, 4  ;;  %s28_s19 = int_to_ptr.vmem [resolvable:$true] %s27_s19 }
   0x3   :  { %s346_s20 = scalar_lea.vmem %s28_s19, 512  ;;  %p351_p1 = scmp.lt.s32.totalorder %s28_s19, %s28_s19 }
   0x4   :  { %p347_p0 = scmp.ne.s32.totalorder %s28_s19, %s346_s20  ;;  %p352_p2 = scmp.lt.s32.totalorder %s346_s20, %s346_s20 }
   0x6   :  { %p353_p3 = por %p352_p2, %p351_p1 }
   0x8   :  { %p354_p4 = pnand %p353_p3, %p347_p0 }
   0xa   :  { %357 = shalt.err (!%p354_p4)
}
   0xb   :  { %s403_s21 = smov 128   ;;  %s404_s22 = smov 8  }
   0xc   :  { %33 = dma.hbm_to_vmem [thread:$0]  %s480_s1, 512, %s28_s19, [#allocation5], %s403_s21, %s403_s21, %s404_s22  }
   0xd   :  { %s405_s25 = smov [#allocation2]   ;;  %s406_s27 = smov [#allocation6]  }
   0xe   :  { %s18_s26 = sshll.u32 %s405_s25, 4  ;;  %s41_s28 = sshll.u32 %s406_s27, 4  ;;  %s19_s26 = int_to_ptr.vmem [resolvable:$true] %s18_s26  ;;  %s42_s28 = int_to_ptr.vmem [resolvable:$true] %s41_s28 }
   0xf   :  { %s366_s29 = scalar_lea.vmem %s19_s26, 128  ;;  %p371_p6 = scmp.lt.s32.totalorder %s19_s26, %s19_s26 }
  0x10   :  { %p367_p5 = scmp.ne.s32.totalorder %s19_s26, %s366_s29  ;;  %p372_p7 = scmp.lt.s32.totalorder %s366_s29, %s366_s29 }
  0x12   :  { %p373_p8 = por %p372_p7, %p371_p6 }
  0x14   :  { %p374_p9 = pnand %p373_p8, %p367_p5 }
  0x16   :  { %377 = shalt.err (!%p374_p9)
}
  0x17   :  { %21 = dma.hbm_to_vmem [thread:$0]  %s479_s0, 128, %s19_s26, [#allocation3]  }
  0x18   :  { %s386_s7 = scalar_lea.vmem %s42_s28, 2048  ;;  %p391_p11 = scmp.lt.s32.totalorder %s42_s28, %s42_s28 }
  0x19   :  { %p387_p10 = scmp.ne.s32.totalorder %s42_s28, %s386_s7  ;;  %p392_p12 = scmp.lt.s32.totalorder %s386_s7, %s386_s7 }
  0x1b   :  { %p393_p13 = por %p392_p12, %p391_p11 }
  0x1d   :  { %p394_p0 = pnand %p393_p13, %p387_p10 }
  0x1f   :  { %397 = shalt.err (!%p394_p0)
}
  0x20   :  { %47 = dma.hbm_to_vmem [thread:$0]  %s482_s3, 2048, %s42_s28, [#allocation5], %s403_s21, %s403_s21, %s404_s22  }
  0x21   :  { %398 = dma.done.wait [#allocation3], 128  }
  0x22   :  { %399 = vsyncadd [#allocation3], 4294967168 }
  0x23   :  { %400 = dma.done.wait [#allocation5], 2560  }
  0x24   :  { %401 = vsyncadd [#allocation5], 4294964736  ;;  %v407_v0 = vmov 0.0   ;;  %vm408_vm0 = vmmov 0   ;;  %v63_v1 = vld [vmem:[#allocation4 + $0x18] sm:$0xff]  ;;  %v62_v2 = vld [vmem:[#allocation4 + $0x10] sm:$0xff] }
  0x25   :  { %281 = vmatprep.subr.mxu0 %v407_v0  ;;  %289 = vmatprep.mubr.msk.f32.mxu0 %vm408_vm0, %v407_v0  ;;  %v161_v3 = vld [vmem:[#allocation6 + $0x78] sm:$0xff]  ;;  %v61_v4 = vld [vmem:[#allocation4 + $0x8] sm:$0xff]  ;;  %v160_v5 = vld [vmem:[#allocation6 + $0x70] sm:$0xff]  ;;  %vm71_vm1 = vcmask 261120  }
  0x26   :  { %292 = vmatprep.subr.mxu1 %v407_v0  ;;  %324 = vmatprep.mubr.msk.f32.mxu1 %vm408_vm0, %v407_v0  ;;  %v159_v6 = vld [vmem:[#allocation6 + $0x68] sm:$0xff]  ;;  %v60_v7 = vld [vmem:[#allocation4] sm:$0xff]  ;;  %v59_v8 = vld [vmem:[#allocation2] sm:$0xff] }
  0x27   :  { %282 = vmatpush3.msra.mxu0 %v63_v1  ;;  %293 = vmatpush3.msra.mxu1 %v161_v3  ;;  %v158_v9 = vld [vmem:[#allocation6 + $0x60] sm:$0xff]  ;;  %v157_v10 = vld [vmem:[#allocation6 + $0x58] sm:$0xff]  ;;  %v156_v11 = vld [vmem:[#allocation6 + $0x50] sm:$0xff] }
  0x28   :  { %283 = vmatprep.subr.mxu0 %v407_v0  ;;  %294 = vmatprep.subr.mxu1 %v407_v0  ;;  %v155_v12 = vld [vmem:[#allocation6 + $0x48] sm:$0xff]  ;;  %v154_v13 = vld [vmem:[#allocation6 + $0x40] sm:$0xff]  ;;  %v153_v14 = vld [vmem:[#allocation6 + $0x38] sm:$0xff] }
  0x29   :  { %284 = vmatpush3.msra.mxu0 %v62_v2  ;;  %295 = vmatpush3.msra.mxu1 %v160_v5  ;;  %v152_v15 = vld [vmem:[#allocation6 + $0x30] sm:$0xff]  ;;  %v151_v16 = vld [vmem:[#allocation6 + $0x28] sm:$0xff]  ;;  %v150_v17 = vld [vmem:[#allocation6 + $0x20] sm:$0xff] }
  0x2a   :  { %285 = vmatprep.subr.mxu0 %v407_v0  ;;  %296 = vmatprep.subr.mxu1 %v407_v0  ;;  %v149_v18 = vld [vmem:[#allocation6 + $0x18] sm:$0xff]  ;;  %v148_v19 = vld [vmem:[#allocation6 + $0x10] sm:$0xff]  ;;  %v147_v20 = vld [vmem:[#allocation6 + $0x8] sm:$0xff] }
  0x2b   :  { %286 = vmatpush3.msra.mxu0 %v61_v4  ;;  %297 = vmatpush3.msra.mxu1 %v159_v6  ;;  %v146_v21 = vld [vmem:[#allocation6] sm:$0xff]  ;;  %v256_v22 = vld [vmem:[%s481_s2] ss:$0 sm:$0xff] }
  0x2c   :  { %287 = vmatprep.subr.mxu0 %v407_v0  ;;  %298 = vmatprep.subr.mxu1 %v407_v0  ;;  %v258_v27 = vld [vmem:[%s483_s4] ss:$0 sm:$0xff] }
  0x2d   :  { %288 = vmatpush3.msra.mxu0 %v60_v7  ;;  %299 = vmatpush3.msra.mxu1 %v158_v9 }
  0x2e   :  { %290 = vmatmul.mubr.msk.f32.vlgmr.msra.gmra.mxu0 %vm71_vm1, %v59_v8  ;;  %300 = vmatprep.subr.mxu1 %v407_v0 }
  0x2f   :  { %301 = vmatpush3.msra.mxu1 %v157_v10 }
  0x30   :  { %302 = vmatprep.subr.mxu1 %v407_v0 }
  0x31   :  { %303 = vmatpush3.msra.mxu1 %v156_v11 }
  0x32   :  { %304 = vmatprep.subr.mxu1 %v407_v0 }
  0x33   :  { %305 = vmatpush3.msra.mxu1 %v155_v12 }
  0x34   :  { %306 = vmatprep.subr.mxu1 %v407_v0 }
  0x35   :  { %307 = vmatpush3.msra.mxu1 %v154_v13 }
  0x36   :  { %308 = vmatprep.subr.mxu1 %v407_v0 }
  0x37   :  { %309 = vmatpush3.msra.mxu1 %v153_v14 }
  0x38   :  { %310 = vmatprep.subr.mxu1 %v407_v0 }
  0x39   :  { %311 = vmatpush3.msra.mxu1 %v152_v15 }
  0x3a   :  { %312 = vmatprep.subr.mxu1 %v407_v0 }
  0x3b   :  { %313 = vmatpush3.msra.mxu1 %v151_v16 }
  0x3c   :  { %314 = vmatprep.subr.mxu1 %v407_v0 }
  0x3d   :  { %315 = vmatpush3.msra.mxu1 %v150_v17 }
  0x3e   :  { %316 = vmatprep.subr.mxu1 %v407_v0 }
  0x3f   :  { %317 = vmatpush3.msra.mxu1 %v149_v18 }
  0x40   :  { %318 = vmatprep.subr.mxu1 %v407_v0 }
  0x41   :  { %319 = vmatpush3.msra.mxu1 %v148_v19 }
  0x42   :  { %320 = vmatprep.subr.mxu1 %v407_v0 }
  0x43   :  { %321 = vmatpush3.msra.mxu1 %v147_v20 }
  0x44   :  { %322 = vmatprep.subr.mxu1 %v407_v0 }
  0x45   :  { %323 = vmatpush3.msra.mxu1 %v146_v21 }
  0xee   :  { %v141_v23 = vpop.f32.mrf.mxu0 }
  0xef   :  { %v142_v24 = vadd.f32 %v256_v22, %v141_v23 }
  0xf0   :  { %v291_v25 = vpop.f32.mrf.mxu0 }
  0xf1   :  { %v145_v26 = vmax.f32 %v142_v24, 0.0 }
  0xf3   :  { %325 = vmatmul.mubr.f32.vlgmr.msra.gmra.mxu1 %v145_v26 }
 0x1b3   :  { %v235_v28 = vpop.f32.mrf.mxu1 }
 0x1b4   :  { %v236_v29 = vadd.f32 %v258_v27, %v235_v28 }
 0x1b5   :  { %v326_v30 = vpop.f32.mrf.mxu1 }
 0x1b6   :  { %239 = vmax.xlane.f32.xlu0 %v236_v29 }
 0x23f   :  { %v240_v31 = vpop.xlane.xlu0 %239 }
 0x240   :  { %v241_v32 = vsub.f32 %v236_v29, %v240_v31 }
 0x242   :  { %v242_v33 = vmul.f32 1.442695, %v241_v32 }
 0x244   :  { %334 = vpow2.f32 %v242_v33 }
 0x251   :  { %v335_v34 = vpop.eup %334 }
 0x252   :  { %244 = vadd.xlane.f32.xlu0 %v335_v34 }
 0x2db   :  { %v245_v35 = vpop.xlane.xlu0 %244 }
 0x2dc   :  { %336 = vrcp.f32 %v245_v35 }
 0x2e9   :  { %v337_v36 = vpop.eup %336 }
 0x2ea   :  { %v248_v37 = vmul.f32 %v337_v36, %v335_v34 }
 0x2ec   :  { %249 = vst [vmem:[%s484_s5] sm:$0xff] %v248_v37 }
 0x2ed   :  { %254 = vsyncpa [#allocation3], 1 }
 0x2ee   :  { %255 = vsyncpa [#allocation5], 1 }

</bundles_post_ra>
